<compile_context>
chip_gen: v7x
topology: tpu7x:2x2x1
jax: 0.10.0
libtpu: 0.0.40
codegen_flags: <defaults>
</compile_context>

<pallas_src>
import functools

import jax
import jax.numpy as jnp
from jax.experimental import pallas as pl
from jax.experimental.pallas import tpu as pltpu

_LANES = 128
_SUBLANES = 8
_CHUNK_ROWS = 512          # 512*128*4 B = 256 KiB of f32 work per unrolled chunk
_MAX_TILE_ROWS = 4096      # 2 MiB f32 tile in the two-pass fallback
_MIN_TILE_ROWS = 512       # never fall back to tiny tiles (per-step overhead)


def _vmem_limit_bytes():
    """Per-chip scoped-VMEM limit: ~48 MiB on the 64 MiB generation (v7x),
    64 MiB on the 128 MiB generations (v5e/v6e)."""
    cap = 64 * 1024 * 1024
    try:
        cap = int(pltpu.get_tpu_info().vmem_capacity_bytes)
    except Exception:
        pass
    return max(32 * 1024 * 1024, min(cap - 16 * 1024 * 1024, 64 * 1024 * 1024))


def _row_chunks(rows, chunk=_CHUNK_ROWS):
    """Static (start, size) schedule covering [0, rows) in <= `chunk` pieces."""
    out, start = [], 0
    while start < rows:
        size = min(chunk, rows - start)
        out.append((start, size))
        start += size
    return out


def _choose_tiling(rows):
    """(tile_rows, padded_rows) for the two-pass fallback.  tile_rows is a
    multiple of 8 and never degenerate-small; if no good divisor of `rows`
    exists, rows are padded with zero rows (stats-neutral, sliced off)."""
    if rows <= _MAX_TILE_ROWS:
        padded = -(-rows // _SUBLANES) * _SUBLANES
        return padded, padded                          # one tile per sample
    for cand in range(_MAX_TILE_ROWS, _MIN_TILE_ROWS - 1, -_SUBLANES):
        if rows % cand == 0:
            return cand, rows                          # exact tiling, no padding
    padded = -(-rows // _MAX_TILE_ROWS) * _MAX_TILE_ROWS
    return _MAX_TILE_ROWS, padded


# ----------------------------- fused single pass ----------------------------

def _fused_kernel(x_ref, *refs, n_valid, eps, affine, per_row_gb):
    """Single-pass LayerNorm over one whole sample resident in VMEM.

    x_ref: (1, rows, 128) sample slab.  refs = ([gb_ref,] o_ref); gb_ref is a
    packed per-row (rows, 2) gamma/beta vector when per_row_gb, else a
    (2, rows, 128) pre-broadcast slab (constant block index -> resident).
    """
    o_ref = refs[-1]
    gb_ref = refs[0] if affine else None
    rows, lanes = x_ref.shape[1], x_ref.shape[2]
    chunks = _row_chunks(rows)

    # pass 1 over VMEM: lane-wise partial sums -> mean
    lane_sum = jnp.zeros((1, lanes), jnp.float32)
    for start, size in chunks:
        xv = x_ref[0, start:start + size, :].astype(jnp.float32)
        lane_sum = lane_sum + jnp.sum(xv, axis=0, keepdims=True)
    mean = jnp.sum(lane_sum, axis=-1, keepdims=True) / n_valid          # (1, 1)

    # pass 2 over VMEM: CENTERED sum of squares (numerically robust)
    lane_sq = jnp.zeros((1, lanes), jnp.float32)
    for start, size in chunks:
        xv = x_ref[0, start:start + size, :].astype(jnp.float32) - mean
        if rows * lanes != n_valid:
            # zero the padded tail so it does not contribute (x - mean)^2
            ridx = jax.lax.broadcasted_iota(jnp.int32, (size, lanes), 0)
            lidx = jax.lax.broadcasted_iota(jnp.int32, (size, lanes), 1)
            fi = (start + ridx) * lanes + lidx
            xv = jnp.where(fi < n_valid, xv, 0.0)
        lane_sq = lane_sq + jnp.sum(xv * xv, axis=0, keepdims=True)
    var = jnp.sum(lane_sq, axis=-1, keepdims=True) / float(max(n_valid - 1, 1))
    # exact divide once per sample (approx reciprocal skipped on purpose to
    # keep the accuracy margin)
    inv = 1.0 / (jnp.sqrt(var) + eps)                                    # (1, 1)

    # pass 3 over VMEM: normalize + per-channel affine, store
    for start, size in chunks:
        xv = (x_ref[0, start:start + size, :].astype(jnp.float32) - mean) * inv
        if affine:
            if per_row_gb:
                gb = gb_ref[start:start + size, :]                       # (size, 2)
                xv = xv * gb[:, 0:1] + gb[:, 1:2]
            else:
                g = gb_ref[0, start:start + size, :]
                b = gb_ref[1, start:start + size, :]
                xv = xv * g + b
        o_ref[0, start:start + size, :] = xv.astype(o_ref.dtype)


# --------------------------- two-pass fallback path --------------------------

def _stats_kernel(x_ref, stats_ref, sum_acc, sq_acc, *, n_valid, eps):
    """Fallback pass 1: per-sample sum / sum-of-squares reduction.

    Grid is (samples, row_tiles) with the reduction (tile) axis innermost.
    stats_ref block is (1, 2, 128): row 0 = mean, row 1 = 1/(std+eps).
    """
    # TODO(synk): for N == 1 on v7x (2 TensorCores) this reduction runs on a
    # single core; a parallel split of the tile axis + tiny combine epilogue
    # would recover the idle core.
    t = pl.program_id(1)

    @pl.when(t == 0)
    def _():
        sum_acc[...] = jnp.zeros_like(sum_acc)
        sq_acc[...] = jnp.zeros_like(sq_acc)

    tile_rows, lanes = x_ref.shape[1], x_ref.shape[2]
    for start, size in _row_chunks(tile_rows):
        xv = x_ref[0, start:start + size, :].astype(jnp.float32)
        sum_acc[...] += jnp.sum(xv, axis=0, keepdims=True)
        sq_acc[...] += jnp.sum(xv * xv, axis=0, keepdims=True)

    @pl.when(t == pl.num_programs(1) - 1)
    def _():
        s = jnp.sum(sum_acc[...], axis=-1, keepdims=True)        # (1, 1)
        q = jnp.sum(sq_acc[...], axis=-1, keepdims=True)
        mean = s / n_valid
        # E[x^2] - E[x]^2 (keeps this pass single-traversal over HBM);
        # clamped against f32 cancellation.  Unbiased divisor as torch.std.
        var = jnp.maximum(q - s * mean, 0.0) / float(max(n_valid - 1, 1))
        inv = 1.0 / (jnp.sqrt(var) + eps)
        stats_ref[0, 0:1, :] = jnp.broadcast_to(mean, (1, lanes))
        stats_ref[0, 1:2, :] = jnp.broadcast_to(inv, (1, lanes))


def _apply_kernel(x_ref, stats_ref, *refs, affine, per_row_gb):
    """Fallback pass 2: normalize + affine (fully parallel grid).

    Grid is (row_tiles, samples) — samples innermost — so the gamma/beta
    block (indexed only by the tile axis) stays resident and is DMA'd once
    per tile instead of once per (sample, tile).
    """
    o_ref = refs[-1]
    gb_ref = refs[0] if affine else None
    mean = stats_ref[0, 0:1, :]                                  # (1, 128)
    inv = stats_ref[0, 1:2, :]
    tile_rows = x_ref.shape[1]
    for start, size in _row_chunks(tile_rows):
        sl = slice(start, start + size)
        xv = (x_ref[0, sl, :].astype(jnp.float32) - mean) * inv
        if affine:
            if per_row_gb:
                gb = gb_ref[sl, :]                               # (size, 2)
                xv = xv * gb[:, 0:1] + gb[:, 1:2]
            else:
                xv = xv * gb_ref[0, sl, :] + gb_ref[1, sl, :]
        o_ref[0, sl, :] = xv.astype(o_ref.dtype)


# ---------------------------------- wrapper ----------------------------------

def layer_norm(x, gamma=None, beta=None, *, eps=1e-5, affine=True,
               force_two_pass=False):
    """Per-sample LayerNorm matching the PyTorch module's forward.

    x: (N, C, *spatial); gamma/beta: (C,).  Returns x's shape and dtype.
    """
    if affine and (gamma is None or beta is None):
        raise ValueError("affine=True requires gamma and beta")
    N, C = x.shape[0], x.shape[1]
    HW = 1
    for d in x.shape[2:]:
        HW *= d
    chw = C * HW
    itemsize = jnp.dtype(x.dtype).itemsize

    lane_pad = (-chw) % _LANES
    rows0 = (chw + lane_pad) // _LANES
    # every 128-lane row lies inside one channel -> compact per-row gamma/beta
    per_row_gb = bool(affine) and (HW % _LANES == 0)

    vmem_limit = _vmem_limit_bytes()
    x_slab = rows0 * _LANES * itemsize
    f32_slab = rows0 * _LANES * 4
    # double-buffered input + output, plus the resident (double-buffered,
    # lane-padded) gamma/beta block, plus headroom for spills / pipelining.
    gb_bufs = 0 if not affine else (2 if per_row_gb else 4)
    fused_vmem = 4 * x_slab + gb_bufs * f32_slab + (4 << 20)
    use_fused = (not force_two_pass) and fused_vmem <= vmem_limit

    if use_fused:
        tile_rows = rows = rows0
    else:
        tile_rows, rows = _choose_tiling(rows0)
    total = rows * _LANES
    pad = total - chw

    x_flat = x.reshape(N, chw)
    if pad:
        # TODO(synk): when C*H*W is not a multiple of 128 this pad (and the
        # matching output slice) costs one extra HBM read+write; removing it
        # needs in-kernel masked tail DMAs instead of a lane-dense reshape.
        x_flat = jnp.pad(x_flat, ((0, 0), (0, pad)))
    x3 = x_flat.reshape(N, rows, _LANES)

    gb = None
    if affine:
        g32 = gamma.astype(jnp.float32)
        b32 = beta.astype(jnp.float32)
        if per_row_gb:
            k = HW // _LANES
            g_row = jnp.repeat(g32, k)
            b_row = jnp.repeat(b32, k)
            if rows != C * k:
                g_row = jnp.pad(g_row, (0, rows - C * k), constant_values=1.0)
                b_row = jnp.pad(b_row, (0, rows - C * k))
            gb = jnp.stack([g_row, b_row], axis=-1)               # (rows, 2)
        else:
            g_flat = jnp.broadcast_to(g32[:, None], (C, HW)).reshape(chw)
            b_flat = jnp.broadcast_to(b32[:, None], (C, HW)).reshape(chw)
            if pad:
                g_flat = jnp.pad(g_flat, (0, pad), constant_values=1.0)
                b_flat = jnp.pad(b_flat, (0, pad))
            gb = jnp.stack([g_flat.reshape(rows, _LANES),
                            b_flat.reshape(rows, _LANES)])        # (2, rows, 128)

    if use_fused:
        kernel = functools.partial(_fused_kernel, n_valid=chw, eps=eps,
                                   affine=affine, per_row_gb=per_row_gb)
        in_specs = [pl.BlockSpec((1, rows, _LANES), lambda n: (n, 0, 0))]
        args = [x3]
        if affine:
            if per_row_gb:
                in_specs.append(pl.BlockSpec((rows, 2), lambda n: (0, 0)))
            else:
                in_specs.append(pl.BlockSpec((2, rows, _LANES),
                                             lambda n: (0, 0, 0)))
            args.append(gb)
        out3 = pl.pallas_call(
            kernel,
            out_shape=jax.ShapeDtypeStruct((N, rows, _LANES), x.dtype),
            grid_spec=pltpu.PrefetchScalarGridSpec(
                num_scalar_prefetch=0,
                grid=(N,),
                in_specs=in_specs,
                out_specs=pl.BlockSpec((1, rows, _LANES), lambda n: (n, 0, 0)),
            ),
            compiler_params=pltpu.CompilerParams(
                dimension_semantics=("parallel",),
                vmem_limit_bytes=vmem_limit,
            ),
        )(*args)
    else:
        num_tiles = rows // tile_rows

        stats = pl.pallas_call(
            functools.partial(_stats_kernel, n_valid=chw, eps=eps),
            out_shape=jax.ShapeDtypeStruct((N, 2, _LANES), jnp.float32),
            grid_spec=pltpu.PrefetchScalarGridSpec(
                num_scalar_prefetch=0,
                grid=(N, num_tiles),
                in_specs=[pl.BlockSpec((1, tile_rows, _LANES),
                                       lambda n, t: (n, t, 0))],
                out_specs=pl.BlockSpec((1, 2, _LANES), lambda n, t: (n, 0, 0)),
                scratch_shapes=[pltpu.VMEM((1, _LANES), jnp.float32),
                                pltpu.VMEM((1, _LANES), jnp.float32)],
            ),
            compiler_params=pltpu.CompilerParams(
                dimension_semantics=("parallel", "arbitrary"),
                vmem_limit_bytes=vmem_limit,
            ),
        )(x3)

        in_specs = [
            pl.BlockSpec((1, tile_rows, _LANES), lambda t, n: (n, t, 0)),
            pl.BlockSpec((1, 2, _LANES), lambda t, n: (n, 0, 0)),
        ]
        args = [x3, stats]
        if affine:
            if per_row_gb:
                in_specs.append(pl.BlockSpec((tile_rows, 2),
                                             lambda t, n: (t, 0)))
            else:
                in_specs.append(pl.BlockSpec((2, tile_rows, _LANES),
                                             lambda t, n: (0, t, 0)))
            args.append(gb)
        out3 = pl.pallas_call(
            functools.partial(_apply_kernel, affine=affine,
                              per_row_gb=per_row_gb),
            out_shape=jax.ShapeDtypeStruct((N, rows, _LANES), x.dtype),
            grid_spec=pltpu.PrefetchScalarGridSpec(
                num_scalar_prefetch=0,
                grid=(num_tiles, N),
                in_specs=in_specs,
                out_specs=pl.BlockSpec((1, tile_rows, _LANES),
                                       lambda t, n: (n, t, 0)),
            ),
            compiler_params=pltpu.CompilerParams(
                dimension_semantics=("parallel", "parallel"),
                vmem_limit_bytes=vmem_limit,
            ),
        )(*args)

    out_flat = out3.reshape(N, total)
    if pad:
        out_flat = out_flat[:, :chw]
    return out_flat.reshape(x.shape)


def layer_norm_ref(x, gamma, beta, *, eps=1e-5, affine=True):
    """Pure-JAX reference mirroring the PyTorch forward exactly."""
    N = x.shape[0]
    xf = x.reshape(N, -1).astype(jnp.float32)
    mean = xf.mean(axis=1)
    var = jnp.sum((xf - mean[:, None]) ** 2, axis=1) / (xf.shape[1] - 1)
    std = jnp.sqrt(var)
    shape = (N,) + (1,) * (x.ndim - 1)
    xn = (x.astype(jnp.float32) - mean.reshape(shape)) / (std.reshape(shape) + eps)
    if affine:
        cshape = (1, -1) + (1,) * (x.ndim - 2)
        xn = xn * gamma.reshape(cshape) + beta.reshape(cshape)
    return xn.astype(x.dtype)


if __name__ == "__main__":
    key = jax.random.PRNGKey(0)
    kx, kg, kx2 = jax.random.split(key, 3)

    # Primary shapes (fused single-pass path, per-row gamma/beta).
    N, C, H, W = 2, 4, 16, 16
    x = jax.random.normal(kx, (N, C, H, W), dtype=jnp.float32)
    # Matches torch.Tensor(num_features).uniform_() -> U[0, 1); beta = zeros.
    gamma = jax.random.uniform(kg, (C,), dtype=jnp.float32)
    beta = jnp.zeros((C,), dtype=jnp.float32)

    out = jax.block_until_ready(layer_norm(x, gamma, beta, eps=1e-5, affine=True))
    ref = layer_norm_ref(x, gamma, beta, eps=1e-5, affine=True)
    assert out.shape == x.shape and out.dtype == x.dtype
    assert jnp.allclose(out, ref, atol=1e-4, rtol=1e-4), "fused path mismatch"

    # Exercise the two-pass fallback (stats + apply) on the same data.
    out2 = jax.block_until_ready(
        layer_norm(x, gamma, beta, eps=1e-5, affine=True, force_two_pass=True))
    assert jnp.allclose(out2, ref, atol=1e-4, rtol=1e-4), "two-pass mismatch"

    # Ragged case (C*H*W % 128 != 0): slab gamma/beta + in-kernel tail mask.
    xr = jax.random.normal(kx2, (2, 3, 5, 5), dtype=jnp.float32)
    gr = jax.random.uniform(kg, (3,), dtype=jnp.float32)
    br = jnp.zeros((3,), dtype=jnp.float32)
    outr = jax.block_until_ready(layer_norm(xr, gr, br, eps=1e-5, affine=True))
    refr = layer_norm_ref(xr, gr, br, eps=1e-5, affine=True)
    assert jnp.allclose(outr, refr, atol=1e-4, rtol=1e-4), "ragged path mismatch"

    print("KERNEL_OK")
</pallas_src>

<mosaic_0001>
module attributes {stable_mosaic.version = 11 : i64} {
  func.func @_fused_kernel(%arg0: i32, %arg1: memref<1x8x128xf32, #tpu.memory_space<vmem>>, %arg2: memref<8x2xf32, #tpu.memory_space<vmem>>, %arg3: memref<1x8x128xf32, #tpu.memory_space<vmem>>) attributes {dimension_semantics = [#tpu.dimension_semantics<parallel>], iteration_bounds = array<i64: 2>, scalar_prefetch = 0 : i64, scratch_operands = 0 : i64, tpu.core_type = #tpu.core_type<tc>, window_params = [{transform_indices = @transform_0, window_bounds = array<i64: 1, 8, 128>}, {pipeline_mode = #tpu.pipeline_mode<synchronous>, transform_indices = @transform_1, window_bounds = array<i64: 8, 2>}, {transform_indices = @transform_2, window_bounds = array<i64: 1, 8, 128>}]} {
    %cst = arith.constant 0.000000e+00 : f32
    %0 = vector.broadcast %cst : f32 to vector<1x128xf32>
    %c0 = arith.constant 0 : index
    %c0_0 = arith.constant 0 : index
    %c0_1 = arith.constant 0 : index
    %1 = vector.load %arg1[%c0, %c0_0, %c0_1] : memref<1x8x128xf32, #tpu.memory_space<vmem>>, vector<1x8x128xf32>
    %2 = vector.shape_cast %1 : vector<1x8x128xf32> to vector<8x128xf32>
    %cst_2 = arith.constant dense<0.000000e+00> : vector<128xf32>
    %3 = vector.multi_reduction <add>, %2, %cst_2 [0] : vector<8x128xf32> to vector<128xf32>
    %4 = vector.shape_cast %3 : vector<128xf32> to vector<1x128xf32>
    %5 = arith.addf %0, %4 : vector<1x128xf32>
    %cst_3 = arith.constant dense<0.000000e+00> : vector<1xf32>
    %6 = vector.multi_reduction <add>, %5, %cst_3 [1] : vector<1x128xf32> to vector<1xf32>
    %7 = vector.shape_cast %6 : vector<1xf32> to vector<1x1xf32>
    %cst_4 = arith.constant 1.024000e+03 : f32
    %8 = vector.broadcast %cst_4 : f32 to vector<1x1xf32>
    %9 = arith.divf %7, %8 : vector<1x1xf32>
    %cst_5 = arith.constant 0.000000e+00 : f32
    %10 = vector.broadcast %cst_5 : f32 to vector<1x128xf32>
    %c0_6 = arith.constant 0 : index
    %c0_7 = arith.constant 0 : index
    %c0_8 = arith.constant 0 : index
    %11 = vector.load %arg1[%c0_6, %c0_7, %c0_8] : memref<1x8x128xf32, #tpu.memory_space<vmem>>, vector<1x8x128xf32>
    %12 = vector.shape_cast %11 : vector<1x8x128xf32> to vector<8x128xf32>
    %13 = vector.broadcast %9 : vector<1x1xf32> to vector<8x128xf32>
    %14 = arith.subf %12, %13 : vector<8x128xf32>
    %15 = arith.mulf %14, %14 : vector<8x128xf32>
    %cst_9 = arith.constant dense<0.000000e+00> : vector<128xf32>
    %16 = vector.multi_reduction <add>, %15, %cst_9 [0] : vector<8x128xf32> to vector<128xf32>
    %17 = vector.shape_cast %16 : vector<128xf32> to vector<1x128xf32>
    %18 = arith.addf %10, %17 : vector<1x128xf32>
    %cst_10 = arith.constant dense<0.000000e+00> : vector<1xf32>
    %19 = vector.multi_reduction <add>, %18, %cst_10 [1] : vector<1x128xf32> to vector<1xf32>
    %20 = vector.shape_cast %19 : vector<1xf32> to vector<1x1xf32>
    %cst_11 = arith.constant 1.023000e+03 : f32
    %21 = vector.broadcast %cst_11 : f32 to vector<1x1xf32>
    %22 = arith.divf %20, %21 : vector<1x1xf32>
    %23 = math.sqrt %22 : vector<1x1xf32>
    %cst_12 = arith.constant 9.99999974E-6 : f32
    %24 = vector.broadcast %cst_12 : f32 to vector<1x1xf32>
    %25 = arith.addf %23, %24 : vector<1x1xf32>
    %cst_13 = arith.constant 1.000000e+00 : f32
    %26 = vector.broadcast %cst_13 : f32 to vector<1x1xf32>
    %27 = arith.divf %26, %25 : vector<1x1xf32>
    %c0_14 = arith.constant 0 : index
    %c0_15 = arith.constant 0 : index
    %c0_16 = arith.constant 0 : index
    %28 = vector.load %arg1[%c0_14, %c0_15, %c0_16] : memref<1x8x128xf32, #tpu.memory_space<vmem>>, vector<1x8x128xf32>
    %29 = vector.shape_cast %28 : vector<1x8x128xf32> to vector<8x128xf32>
    %30 = vector.broadcast %9 : vector<1x1xf32> to vector<8x128xf32>
    %31 = arith.subf %29, %30 : vector<8x128xf32>
    %32 = vector.broadcast %27 : vector<1x1xf32> to vector<8x128xf32>
    %33 = arith.mulf %31, %32 : vector<8x128xf32>
    %c0_17 = arith.constant 0 : index
    %c0_18 = arith.constant 0 : index
    %34 = vector.load %arg2[%c0_17, %c0_18] : memref<8x2xf32, #tpu.memory_space<vmem>>, vector<8x2xf32>
    %35 = vector.extract_strided_slice %34 {offsets = [0, 0], sizes = [8, 1], strides = [1, 1]} : vector<8x2xf32> to vector<8x1xf32>
    %36 = vector.broadcast %35 : vector<8x1xf32> to vector<8x128xf32>
    %37 = arith.mulf %33, %36 : vector<8x128xf32>
    %38 = vector.extract_strided_slice %34 {offsets = [0, 1], sizes = [8, 1], strides = [1, 1]} : vector<8x2xf32> to vector<8x1xf32>
    %39 = vector.broadcast %38 : vector<8x1xf32> to vector<8x128xf32>
    %40 = arith.addf %37, %39 : vector<8x128xf32>
    %c0_19 = arith.constant 0 : index
    %c0_20 = arith.constant 0 : index
    %c0_21 = arith.constant 0 : index
    %41 = vector.load %arg3[%c0_19, %c0_20, %c0_21] : memref<1x8x128xf32, #tpu.memory_space<vmem>>, vector<1x8x128xf32>
    %42 = vector.shape_cast %41 : vector<1x8x128xf32> to vector<8x128xf32>
    %43 = vector.shape_cast %40 : vector<8x128xf32> to vector<1x8x128xf32>
    tpu.vector_store %arg3[%c0_19, %c0_20, %c0_21], %43 {strides = array<i32>} : memref<1x8x128xf32, #tpu.memory_space<vmem>>, vector<1x8x128xf32>,
    return
  }
  func.func @transform_0(%arg0: i32) -> (i32, i32, i32) {
    %c0_i32 = arith.constant 0 : i32
    %c0_i32_0 = arith.constant 0 : i32
    %c0_i32_1 = arith.constant 0 : i32
    return %arg0, %c0_i32, %c0_i32_0 : i32, i32, i32
  }
  func.func @transform_1(%arg0: i32) -> (i32, i32) {
    %c0_i32 = arith.constant 0 : i32
    %c0_i32_0 = arith.constant 0 : i32
    %c0_i32_1 = arith.constant 0 : i32
    return %c0_i32, %c0_i32_0 : i32, i32
  }
  func.func @transform_2(%arg0: i32) -> (i32, i32, i32) {
    %c0_i32 = arith.constant 0 : i32
    %c0_i32_0 = arith.constant 0 : i32
    %c0_i32_1 = arith.constant 0 : i32
    return %arg0, %c0_i32, %c0_i32_0 : i32, i32, i32
  }
}

</mosaic_0001>

<bundles_post_ra>
// kernel: tpu_custom_call.1
= control target key start
LH: loop header
LB: loop body
LE: loop exit
PB: predicated region body
PF: predicated region fallthrough
CT: control target
= control target key end

     0   :  { %7 = vsyncpa [#allocation3], 0  ;;  %s644_s0 = inlined_call_operand.hbm [shape: f32[2,8,128], index: 0, kind: input, shape index: {}]   ;;  %s645_s1 = inlined_call_operand.vmem [shape: f32[8,2], index: 1, kind: input, shape index: {}]   ;;  %s646_s2 = inlined_call_operand.hbm [shape: f32[2,8,128], index: 2, kind: output, shape index: {}]  }
   0x1   :  { %9 = vsyncpa [#allocation3 + $0x1], 0 }
   0x2   :  { %10 = vsyncpa [#allocation4], 0 }
   0x3   :  { %12 = vsyncpa [#allocation4 + $0x1], 0  ;;  %s476_s9 = smov 0   ;;  %s478_s10 = smov 0  }
   0x4   :  { %s480_s11 = smov 0   ;;  %s482_s12 = smov 0  }
   0x5 LB: > { %s497_s13 = sadd.s32 4294967295, %s455_s12   ;;  %s292_s14 = sadd.s32 4294967294, %s455_s12   ;;  %s455_s12 = sphi %s482_s12, %s661_s12   ;;  %s451_s11 = sphi %s480_s11, %s660_s11   ;;  %s447_s10 = sphi %s478_s10, %s659_s10   ;;  %s443_s9 = sphi %s476_s9, %s658_s9  }
   0x6   : > { %s501_s15 = sadd.s32 1, %s455_s12   ;;  %s25_s16 = sadd.s32 1, %s451_s11 }
   0x7   : > { %s22_s17 = ssub.s32 %s455_s12, %s501_s15  ;;  %p32_p0 = scmp.ne.s32.totalorder %s451_s11, %s447_s10 }
   0x8   : > { %p23_p1 = scmp.eq.s32.totalorder %s22_s17, 0  ;;  %p33_p2 = scmp.eq.s32.totalorder %s455_s12, 0 }
   0x9   : > { %p38_p3 = scmp.ne.s32.totalorder %s447_s10, %s443_s9  ;;  %p39_p4 = scmp.eq.s32.totalorder %s497_s13, 0 }
   0xa   : > { %s513_s18 = scalar_select %p23_p1, %s451_s11, %s25_s16  }
   0xb   : > { %p515_p5 = por %p33_p2, %p32_p0  ;;  %p519_p6 = por %p39_p4, %p38_p3 }
   0xc   : > { %p83_p7 = scmp.eq.s32.totalorder %s497_s13, 1  ;;  %p89_p8 = scmp.eq.s32.totalorder %s292_s14, 1 }
   0xd   : > { %p316_p10 = scmp.lt.s32.totalorder %s455_s12, 2  ;;  %s112_s23 = sand.u32 1, %s451_s11  }
   0xe   : > { %p526_p11 = por %p83_p7, %p32_p0  ;;  %p530_p12 = por %p89_p8, %p38_p3 }
   0xf   : > { %s296_s24 = sshll.u32 %s455_s12, 7  ;;  %s295_s25 = sshll.u32 %s112_s23, 3 }
  0x10   : > { %s650_s21 = scalar_select %p526_p11, 1, 0 }
  0x11   : > { %s651_s22 = scalar_select %p530_p12, 1, 0 }
  0x12   : > { %s539_s28 = scalar_lea.hbm %s644_s0, %s296_s24  ;;  %s116_s29 = scalar_lea.vmem [#allocation2], %s295_s25 }
  0x13   : > { %s123_s30 = sshll.u32 %s116_s29, 4  ;;  %p543_p13 = pnand %p316_p10, %p515_p5  ;;  %s547_s30 = int_to_ptr.vmem [resolvable:$true] %s123_s30 }
  0x14   : > { %s113_s4 = scalar_lea.sflag [#allocation3], %s112_s23  ;;  %s359_s5 = scalar_lea.hbm %s539_s28, 128 }
  0x15   : > { %p360_p2 = scmp.ne.s32.totalorder %s539_s28, %s359_s5  ;;  %p361_p3 = pneg %p543_p13 }
  0x16   : > { %s364_s8 = scalar_lea.hbm %s644_s0, 256  ;;  %p365_p5 = scmp.lt.u32.totalorder %s539_s28, %s644_s0 }
  0x17   : > { %p362_p4 = pnand %p361_p3, %p360_p2  ;;  %p366_p8 = scmp.lt.u32.totalorder %s364_s8, %s359_s5 }
  0x18   : > { %p368_p9 = scmp.lt.u32.totalorder %s359_s5, %s539_s28 }
  0x19   : > { %p363_p7 = pneg %p362_p4  ;;  %p367_p10 = por %p366_p8, %p365_p5 }
  0x1b   : > { %p369_p0 = por %p368_p9, %p367_p10 }
  0x1d   : > { %p370_p1 = pnand %p369_p0, %p363_p7 }
  0x1f   : > { %373 = shalt.err (!%p370_p1)
}
  0x20   : > { %s374_s17 = scalar_lea.vmem %s547_s30, 128  ;;  %s457_s19 = smov [#allocation2]  }
  0x21   : > { %p375_p2 = scmp.ne.s32.totalorder %s547_s30, %s374_s17  ;;  %s379_s23 = sshll.u32 %s457_s19, 4  ;;  %s380_s23 = int_to_ptr.vmem [resolvable:$false] %s379_s23 }
  0x22   : > { %s381_s24 = scalar_lea.vmem %s380_s23, 256  ;;  %p382_p11 = scmp.lt.s32.totalorder %s547_s30, %s380_s23 }
  0x23   : > { %p377_p4 = pnand %p375_p2, %p361_p3  ;;  %p383_p5 = scmp.lt.s32.totalorder %s381_s24, %s374_s17 }
  0x25   : > { %p378_p12 = pneg %p377_p4  ;;  %p384_p8 = por %p383_p5, %p382_p11 }
  0x27   : > { %p385_p9 = pnand %p384_p8, %p378_p12 }
  0x29   : > { %388 = shalt.err (!%p385_p9)
}
  0x2a   : > { %311 = dma.hbm_to_vmem [thread:$0]  (!%p543_p13), %s539_s28, 128, %s547_s30, %s113_s4  }
  0x2b   : > { %p653_p0 = scmp.lt.s32.totalorder %s455_s12, 3  ;;  %p654_p1 = scmp.ge.s32.totalorder %s455_s12, 1 }
  0x2d   : > { %p129_p3 = pnand %p654_p1, %p653_p0 }
  0x2e   : > { %s581_s25 = sand.u32 (!%p129_p3), 1, %s447_s10  }
  0x2f   : > { %132 = sbr.rel (%p129_p3) target bundleno = 420 (0x1a4), region = 28  ;;  %s298_s26 = sshll.u32 (!%p129_p3), %s581_s25, 3 }
  0x30   : > { %s135_s27 = scalar_lea.sflag (!%p129_p3), [#allocation3], %s581_s25  ;;  %s138_s29 = scalar_lea.vmem (!%p129_p3), [#allocation2], %s298_s26 }
  0x36   : > { %434 = dma.done.wait (%p519_p6), %s135_s27, 128  }
  0x37   : > { %436 = vsyncadd (%p519_p6), %s135_s27, 4294967168  ;;  %v159_v0 = vld [vmem:[%s138_s29] sm:$0xff]  ;;  %v458_v8 = vmov 0   ;;  %v459_v9 = vmov 1   ;;  %s301_s20 = sshll.u32 %s497_s13, 7  ;;  %s158_s3 = scalar_lea.vmem [#allocation5], %s298_s26 }
  0x38   : > { %v160_v1 = vrot.slane %v159_v0, 4  ;;  %v195_v7 = vld [vmem:[%s645_s1] sm:$0xff]  ;;  %352 = vset.pattern.permute.xlu1 %v458_v8  ;;  %354 = vset.pattern.permute.xlu0 %v459_v9  ;;  %s222_s4 = sshll.u32 %s158_s3, 4  ;;  %s600_s7 = scalar_lea.hbm %s646_s2, %s301_s20  ;;  %s602_s4 = int_to_ptr.vmem [resolvable:$true] %s222_s4 }
  0x39   : > { %198 = vperm.xlu1 %352, %v195_v7   ;;  %s209_s8 = scalar_lea.sflag [#allocation4], %s581_s25  ;;  %s389_s14 = scalar_lea.vmem %s602_s4, 128 }
  0x3a   : > { %v161_v2 = vadd.f32 %v160_v1, %v159_v0  ;;  %p390_p6 = scmp.ne.s32.totalorder %s602_s4, %s389_s14  ;;  %p655_p11 = scmp.ne.s32.totalorder %s650_s21, 0 }
  0x3b   : > { %s460_s13 = smov [#allocation5]  }
  0x3c   : > { %v162_v3 = vrot.slane %v161_v2, 2  ;;  %p391_p12 = pnand %p390_p6, %p655_p11  ;;  %s393_s16 = sshll.u32 %s460_s13, 4  ;;  %s394_s16 = int_to_ptr.vmem [resolvable:$false] %s393_s16 }
  0x3d   : > { %353 = vset.pattern.permute.xlu1 %v459_v9  ;;  %s395_s17 = scalar_lea.vmem %s394_s16, 256  ;;  %p396_p7 = scmp.lt.s32.totalorder %s602_s4, %s394_s16 }
  0x3e   : > { %v163_v4 = vadd.f32 %v162_v3, %v161_v2  ;;  %203 = vperm.xlu1 %353, %v195_v7   ;;  %p392_p13 = pneg %p391_p12  ;;  %p397_p10 = scmp.lt.s32.totalorder %s395_s17, %s389_s14 }
  0x40   : > { %v164_v5 = vrot.slane %v163_v4, 1  ;;  %p398_p2 = por %p397_p10, %p396_p7 }
  0x42   : > { %v165_v6 = vadd.f32 %v164_v5, %v163_v4  ;;  %p399_p4 = pnand %p398_p2, %p392_p13 }
  0x44   : > { %167 = vadd.xlane.f32.xlu0 %v165_v6 }
  0xb8   : > { %v199_v28 = vpop.permute.xlu1 %198 }
  0xbd   : > { %v204_v31 = vpop.permute.xlu1 %203 }
  0xd1   : > { %v168_v10 = vpop.xlane.xlu0 %167 }
  0xd2   : > { %v170_v11 = vmul.f32 0.0009765625, %v168_v10 }
  0xd4   : > { %v171_v12 = vsub.f32 %v159_v0, %v170_v11 }
  0xd6   : > { %v172_v13 = vmul.f32 %v171_v12, %v171_v12 }
  0xd8   : > { %v173_v14 = vrot.slane %v172_v13, 4 }
  0xda   : > { %v174_v15 = vadd.f32 %v173_v14, %v172_v13 }
  0xdc   : > { %v175_v16 = vrot.slane %v174_v15, 2 }
  0xde   : > { %v176_v17 = vadd.f32 %v175_v16, %v174_v15 }
  0xe0   : > { %v177_v18 = vrot.slane %v176_v17, 1 }
  0xe2   : > { %v178_v19 = vadd.f32 %v177_v18, %v176_v17 }
  0xe4   : > { %180 = vadd.xlane.f32.xlu0 %v178_v19 }
 0x171   : > { %v181_v20 = vpop.xlane.xlu0 %180 }
 0x172   : > { %v183_v21 = vmul.f32 0.0009775171, %v181_v20 }
 0x174   : > { %355 = vrsqrt.f32 %v183_v21  ;;  %vm186_vm0 = vcmp.eq.f32.partialorder %v183_v21, inf  ;;  %v189_v24 = vand.u32 2147483648, %v183_v21  ;;  %vm188_vm1 = vcmp.eq.f32.partialorder %v183_v21, 0.0 }
 0x17e   : > { %v356_v22 = vpop.eup %355 }
 0x17f   : > { %v185_v23 = vmul.f32 %v356_v22, %v183_v21 }
 0x181   : > { %v187_v25 = vsel %vm186_vm0, %v183_v21, %v185_v23 }
 0x182   : > { %v190_v26 = vsel %vm188_vm1, %v189_v24, %v187_v25 }
 0x183   : > { %v191_v27 = vadd.f32 1e-05, %v190_v26 }
 0x185   : > { %357 = vrcp.f32 %v191_v27 }
 0x18f   : > { %v358_v29 = vpop.eup %357 }
 0x190   : > { %v194_v30 = vmul.f32 %v358_v29, %v171_v12 }
 0x192   : > { %v201_v32 = vmul.f32 %v199_v28, %v194_v30 }
 0x194   : > { %v206_v33 = vadd.f32 %v204_v31, %v201_v32 }
 0x196   : > { %207 = vst [vmem:[%s158_s3] sm:$0xff] %v206_v33 }
 0x197   : > { %402 = shalt.err (!%p399_p4)
}
 0x198   : > { %s403_s19 = scalar_lea.hbm %s600_s7, 128  ;;  %s407_s25 = scalar_lea.hbm %s646_s2, 256 }
 0x199   : > { %p404_p5 = scmp.ne.s32.totalorder %s600_s7, %s403_s19  ;;  %p408_p0 = scmp.lt.u32.totalorder %s600_s7, %s646_s2 }
 0x19a   : > { %p409_p1 = scmp.lt.u32.totalorder %s407_s25, %s403_s19  ;;  %p411_p6 = scmp.lt.u32.totalorder %s403_s19, %s600_s7 }
 0x19b   : > { %p405_p8 = pnand %p404_p5, %p655_p11 }
 0x19c   : > { %p410_p3 = por %p409_p1, %p408_p0 }
 0x19d   : > { %p406_p9 = pneg %p405_p8 }
 0x19e   : > { %p412_p12 = por %p411_p6, %p410_p3 }
 0x1a0   : > { %p413_p13 = pnand %p412_p12, %p406_p9 }
 0x1a2   : > { %416 = shalt.err (!%p413_p13)
}
 0x1a3   : > { %306 = dma.vmem_to_hbm [thread:$0]  (%p655_p11), %s602_s4, 128, %s600_s7, %s209_s8  }
 0x1a4 PF: > { %s234_s29 = sand.u32 1, %s443_s9   ;;  %p656_p7 = scmp.ne.s32.totalorder %s651_s22, 0 }
 0x1a5   : > { %p657_p10 = scmp.ge.s32.totalorder %s455_s12, 2  ;;  %s235_s28 = scalar_lea.sflag [#allocation4], %s234_s29 }
 0x1a7   : > { %p313_p2 = pnand %p657_p10, %p656_p7 }
 0x1a9   : > { %438 = dma.done.wait (!%p313_p2), %s235_s28, 128  }
 0x1aa   : > { %440 = vsyncadd (!%p313_p2), %s235_s28, 4294967168  ;;  %p15_p4 = scmp.ge.s32.totalorder %s501_s15, 4   ;;  %s658_s9 = smov %s447_s10 }
 0x1ab   : > { %s659_s10 = smov %s451_s11  ;;  %s660_s11 = smov %s513_s18 }
 0x1ac   : > { %s661_s12 = smov %s501_s15  ;;  %17 = sbr.rel (!%p15_p4) target bundleno = 5 (0x5), region = 73 }
 0x1b3   :  { %240 = vsyncpa [#allocation3], 1 }
 0x1b4   :  { %242 = vsyncpa [#allocation3 + $0x1], 1 }
 0x1b5   :  { %243 = vsyncpa [#allocation4], 1 }
 0x1b6   :  { %245 = vsyncpa [#allocation4 + $0x1], 1 }

</bundles_post_ra>
